<compile_context>
chip_gen: v5e
topology: v5e:2x2
jax: 0.10.0
libtpu: 0.0.40
codegen_flags: <defaults>
</compile_context>

<pallas_src>
import jax
import jax.numpy as jnp
from jax import lax
from jax.experimental import pallas as pl
from jax.experimental.pallas import tpu as pltpu


def _cdiv(a, b):
    return -(-a // b)


def _round_down_mult(n, m):
    return (n // m) * m


def _vmem_capacity_bytes():
    # Generation-aware cap (v5e/v6e: 128 MiB, v7x: 64 MiB per TensorCore). Fall
    # back to the smallest (v7x) so we never over-request VMEM anywhere.
    try:
        cap = int(pltpu.get_tpu_info().vmem_capacity_bytes)
        if cap > 0:
            return cap
    except Exception:
        pass
    return 64 << 20


# ----------------------------------------------------------------------------
# Single-pass kernel: whole (C, HW) slab of one batch element is VMEM-resident.
# ----------------------------------------------------------------------------
def _single_pass_kernel(x_ref, beta_ref, out_ref):
    x = x_ref[0]                                  # (C, HW), input dtype (MXU rate)

    # gram = feat_a @ feat_a^T, contracting the HW (lane) axis of x with itself.
    gram = lax.dot_general(
        x, x,
        dimension_numbers=(((1,), (1,)), ((), ())),
        preferred_element_type=jnp.float32,
    )
    # softmax(rowmax - gram) == softmax(-gram); exact normalization (no approx).
    neg = -gram
    neg = neg - jnp.max(neg, axis=-1, keepdims=True)
    e = jnp.exp(neg)
    p = e / jnp.sum(e, axis=-1, keepdims=True)

    feat_e = jnp.dot(p.astype(x.dtype), x, preferred_element_type=jnp.float32)
    out_ref[0] = (beta_ref[0] * feat_e + x.astype(jnp.float32)).astype(out_ref.dtype)


# ----------------------------------------------------------------------------
# Two-pass streaming kernel (bounded VMEM, HW tiled).
# ----------------------------------------------------------------------------
def _make_tiled_kernel(hw, t_hw):
    needs_mask = (hw % t_hw) != 0                 # static: last tile is partial?

    def kernel(x_ref, beta_ref, out_ref, gram_ref, p_ref):
        # x_ref:    (1, C, t_hw) tile of one batch element (input dtype)
        # beta_ref: (1,) SMEM scalar
        # out_ref:  (1, C, t_hw) output tile
        # gram_ref: (C, C) f32 scratch, persists across grid steps
        # p_ref:    (C, C) scratch holding softmax(attention), in x dtype
        phase = pl.program_id(1)
        kt = pl.program_id(2)
        x = x_ref[0]                              # (C, t_hw)

        @pl.when(jnp.logical_and(phase == 0, kt == 0))
        def _init():
            gram_ref[...] = jnp.zeros_like(gram_ref)

        @pl.when(phase == 0)
        def _accumulate():
            xa = x
            if needs_mask:
                # Zero the out-of-range lanes of the (partial) last tile before
                # the gram accumulation; their buffer content is undefined.
                valid = hw - kt * t_hw            # phase-0 block index == kt
                lane = lax.broadcasted_iota(jnp.int32, x.shape, 1)
                xa = jnp.where(lane < valid, x, jnp.zeros_like(x))
            # Transpose-free: contract the HW axis of the tile with itself.
            gram_ref[...] += lax.dot_general(
                xa, xa,
                dimension_numbers=(((1,), (1,)), ((), ())),
                preferred_element_type=jnp.float32,
            )

        @pl.when(jnp.logical_and(phase == 1, kt == 0))
        def _softmax():
            neg = -gram_ref[...]                  # softmax(rowmax - g) == softmax(-g)
            neg = neg - jnp.max(neg, axis=-1, keepdims=True)
            e = jnp.exp(neg)
            p_ref[...] = (e / jnp.sum(e, axis=-1, keepdims=True)).astype(p_ref.dtype)

        @pl.when(phase == 1)
        def _emit():
            # Out-of-range lanes of a partial tile compute garbage here, but they
            # are masked away on the partial-block output writeback.
            feat_e = jnp.dot(p_ref[...], x, preferred_element_type=jnp.float32)
            out_ref[0] = (beta_ref[0] * feat_e + x.astype(jnp.float32)).astype(out_ref.dtype)

    return kernel


def channel_attention_module(x, beta, *, max_hw_tile=2048, single_pass=None):
    """Pallas implementation of _ChannelAttentionModule.forward.

    Args:
      x:    (B, C, H, W) array (NCHW, matching PyTorch).
      beta: scalar / (1,) parameter (nn.Parameter(torch.zeros(1)) in the module).
      max_hw_tile: cap on the lane (HW) tile used by the streaming path.
      single_pass: force (True) / forbid (False) the VMEM-resident single-pass
        path; None = auto-select from the VMEM budget.
    Returns:
      (B, C, H, W) array with the dtype of x.
    """
    B, C, H, W = x.shape
    HW = H * W
    x_flat = x.reshape(B, C, HW)
    itemsize = x_flat.dtype.itemsize
    beta_s = jnp.asarray(beta, dtype=jnp.float32).reshape((1,))

    cap = _vmem_capacity_bytes()
    budget = cap - (8 << 20)                      # headroom for Mosaic internals

    # ---- single-pass fast path: x read from HBM once per batch element --------
    single_need = 4 * C * HW * itemsize + 2 * C * C * 4 + (2 << 20)
    if single_pass is None:
        single_pass = single_need <= min(budget, 48 << 20)

    if single_pass:
        out_flat = pl.pallas_call(
            _single_pass_kernel,
            out_shape=jax.ShapeDtypeStruct((B, C, HW), x.dtype),
            grid_spec=pltpu.PrefetchScalarGridSpec(
                num_scalar_prefetch=0,
                grid=(B,),
                in_specs=[
                    pl.BlockSpec((1, C, HW), lambda b: (b, 0, 0)),
                    pl.BlockSpec(memory_space=pltpu.MemorySpace.SMEM),
                ],
                out_specs=pl.BlockSpec((1, C, HW), lambda b: (b, 0, 0)),
            ),
            compiler_params=pltpu.CompilerParams(
                dimension_semantics=("parallel",),
                vmem_limit_bytes=int(min(budget, max(single_need, 32 << 20))),
            ),
        )(x_flat, beta_s)
        return out_flat.reshape(B, C, H, W)

    # ---- two-pass streaming path (VMEM bounded regardless of image size) ------
    scratch_bytes = C * C * (4 + itemsize)        # f32 gram + p in x dtype
    tile_budget = min(budget, 56 << 20) - scratch_bytes - (2 << 20)
    t_hw = max(128, _round_down_mult(tile_budget // (4 * C * itemsize), 128))
    t_hw = min(t_hw, max(128, _round_down_mult(max_hw_tile, 128)))
    if t_hw >= HW:
        t_hw = HW                                 # one full-extent block
    kt_n = _cdiv(HW, t_hw)
    vmem_est = 4 * C * t_hw * itemsize + scratch_bytes + (2 << 20)

    kernel = _make_tiled_kernel(HW, t_hw)
    out_flat = pl.pallas_call(
        kernel,
        out_shape=jax.ShapeDtypeStruct((B, C, HW), x.dtype),
        grid_spec=pltpu.PrefetchScalarGridSpec(
            num_scalar_prefetch=0,
            grid=(B, 2, kt_n),
            in_specs=[
                # Phase 0 walks kt forward; phase 1 walks it backward so the tile
                # resident at the phase boundary repeats and its DMA is skipped.
                pl.BlockSpec(
                    (1, C, t_hw),
                    lambda b, ph, kt: (b, 0, (1 - ph) * kt + ph * (kt_n - 1 - kt)),
                ),
                pl.BlockSpec(memory_space=pltpu.MemorySpace.SMEM),
            ],
            # Pinned at phase 1's starting tile during phase 0 (never written
            # there), so each output block is written exactly once before its
            # writeback; a partial last block is masked on writeback.
            out_specs=pl.BlockSpec(
                (1, C, t_hw),
                lambda b, ph, kt: (b, 0, (kt_n - 1) - ph * kt),
            ),
            scratch_shapes=[
                pltpu.VMEM((C, C), jnp.float32),  # gram accumulator (f32)
                pltpu.VMEM((C, C), x.dtype),      # softmax(attention), MXU operand
            ],
        ),
        compiler_params=pltpu.CompilerParams(
            dimension_semantics=("parallel", "arbitrary", "arbitrary"),
            vmem_limit_bytes=int(min(budget, max(vmem_est + (2 << 20), 32 << 20))),
        ),
    )(x_flat, beta_s)
    # TODO(synk): for B == 1 on v7x, split phase-1 tiles (or C rows) across the two
    # TensorCores via a core-parallel leading grid axis; B >= 2 already uses megacore.
    return out_flat.reshape(B, C, H, W)


def _reference(x, beta):
    # Pure-JAX reference matching the PyTorch forward exactly.
    B, C, H, W = x.shape
    feat_a = x.reshape(B, C, H * W).astype(jnp.float32)
    attention = jnp.einsum("bcn,bdn->bcd", feat_a, feat_a)
    attention_new = jnp.max(attention, axis=-1, keepdims=True) - attention
    attention = jax.nn.softmax(attention_new, axis=-1)
    feat_e = jnp.einsum("bcd,bdn->bcn", attention, feat_a).reshape(B, C, H, W)
    return (jnp.asarray(beta).reshape(()) * feat_e + x.astype(jnp.float32)).astype(x.dtype)


if __name__ == "__main__":
    key = jax.random.PRNGKey(0)
    B, C, H, W = 2, 4, 16, 16
    x = jax.random.normal(key, (B, C, H, W), dtype=jnp.float32)

    # Parameter init exactly as in the PyTorch module: beta = zeros(1).
    beta0 = jnp.zeros((1,), dtype=jnp.float32)
    out = jax.block_until_ready(channel_attention_module(x, beta0))
    ref = _reference(x, beta0)
    assert out.shape == (B, C, H, W)
    assert jnp.allclose(out, ref, atol=1e-4, rtol=1e-4), float(jnp.max(jnp.abs(out - ref)))

    # Nonzero beta exercises the attention + residual path (exact softmax now).
    beta_nz = jnp.array([0.5], dtype=jnp.float32)
    out_nz = jax.block_until_ready(channel_attention_module(x, beta_nz))
    ref_nz = _reference(x, beta_nz)
    assert jnp.allclose(out_nz, ref_nz, atol=2e-3, rtol=2e-3), float(jnp.max(jnp.abs(out_nz - ref_nz)))

    # Non-128-multiple HW through the single-pass path (full-extent block, no pad).
    x2 = jax.random.normal(jax.random.PRNGKey(1), (1, 8, 30, 30), dtype=jnp.float32)
    ref2 = _reference(x2, beta_nz)
    out2 = jax.block_until_ready(channel_attention_module(x2, beta_nz))
    assert jnp.allclose(out2, ref2, atol=2e-3, rtol=2e-3), float(jnp.max(jnp.abs(out2 - ref2)))

    # Force the two-pass streaming path with a partial (in-kernel masked) last tile.
    out3 = jax.block_until_ready(
        channel_attention_module(x2, beta_nz, single_pass=False, max_hw_tile=256))
    assert jnp.allclose(out3, ref2, atol=2e-3, rtol=2e-3), float(jnp.max(jnp.abs(out3 - ref2)))

    # Two-pass path with exact tiling (multiple tiles, multiple batch elements).
    x3 = jax.random.normal(jax.random.PRNGKey(2), (2, 8, 16, 16), dtype=jnp.float32)
    ref3 = _reference(x3, beta_nz)
    out4 = jax.block_until_ready(
        channel_attention_module(x3, beta_nz, single_pass=False, max_hw_tile=128))
    assert jnp.allclose(out4, ref3, atol=2e-3, rtol=2e-3), float(jnp.max(jnp.abs(out4 - ref3)))

    print("KERNEL_OK")
</pallas_src>

<mosaic_0001>
module attributes {stable_mosaic.version = 11 : i64} {
  func.func @_single_pass_kernel(%arg0: i32, %arg1: memref<1x4x256xf32, #tpu.memory_space<vmem>>, %arg2: memref<1xf32, #tpu.memory_space<smem>>, %arg3: memref<1x4x256xf32, #tpu.memory_space<vmem>>) attributes {dimension_semantics = [#tpu.dimension_semantics<parallel>], iteration_bounds = array<i64: 2>, scalar_prefetch = 0 : i64, scratch_operands = 0 : i64, tpu.core_type = #tpu.core_type<tc>, window_params = [{transform_indices = @transform_0, window_bounds = array<i64: 1, 4, 256>}, {transform_indices = @transform_1, window_bounds = array<i64: 1>}, {transform_indices = @transform_2, window_bounds = array<i64: 1, 4, 256>}]} {
    %c0 = arith.constant 0 : index
    %c0_0 = arith.constant 0 : index
    %c0_1 = arith.constant 0 : index
    %0 = vector.load %arg1[%c0, %c0_0, %c0_1] : memref<1x4x256xf32, #tpu.memory_space<vmem>>, vector<1x4x256xf32>
    %1 = vector.shape_cast %0 : vector<1x4x256xf32> to vector<4x256xf32>
    %cst = arith.constant dense<0.000000e+00> : vector<4x4xf32>
    %2 = tpu.matmul %1, %1, %cst {dimension_numbers = #tpu.dot_dimension_numbers<[1], [1], [0], [0], [0, 0, 1, 0], [], []>} : vector<4x256xf32>, vector<4x256xf32>, vector<4x4xf32> -> vector<4x4xf32>
    %cst_2 = arith.constant 0.000000e+00 : f32
    %3 = vector.broadcast %cst_2 : f32 to vector<4x4xf32>
    %4 = arith.subf %3, %2 : vector<4x4xf32>
    %cst_3 = arith.constant dense<0xFF800000> : vector<4xf32>
    %5 = vector.multi_reduction <maximumf>, %4, %cst_3 [1] : vector<4x4xf32> to vector<4xf32>
    %6 = vector.shape_cast %5 : vector<4xf32> to vector<4x1xf32>
    %7 = vector.broadcast %6 : vector<4x1xf32> to vector<4x4xf32>
    %8 = arith.subf %4, %7 : vector<4x4xf32>
    %9 = math.exp %8 : vector<4x4xf32>
    %cst_4 = arith.constant dense<0.000000e+00> : vector<4xf32>
    %10 = vector.multi_reduction <add>, %9, %cst_4 [1] : vector<4x4xf32> to vector<4xf32>
    %11 = vector.shape_cast %10 : vector<4xf32> to vector<4x1xf32>
    %12 = vector.broadcast %11 : vector<4x1xf32> to vector<4x4xf32>
    %13 = arith.divf %9, %12 : vector<4x4xf32>
    %cst_5 = arith.constant dense<0.000000e+00> : vector<4x256xf32>
    %14 = tpu.matmul %13, %1, %cst_5 {dimension_numbers = #tpu.dot_dimension_numbers<[1], [0], [0], [1], [0, 0, 1, 1], [], []>} : vector<4x4xf32>, vector<4x256xf32>, vector<4x256xf32> -> vector<4x256xf32>
    %c0_6 = arith.constant 0 : index
    %15 = memref.load %arg2[%c0_6] : memref<1xf32, #tpu.memory_space<smem>>
    %16 = vector.broadcast %15 : f32 to vector<4x256xf32>
    %17 = arith.mulf %16, %14 : vector<4x256xf32>
    %18 = arith.addf %17, %1 : vector<4x256xf32>
    %c0_7 = arith.constant 0 : index
    %c0_8 = arith.constant 0 : index
    %c0_9 = arith.constant 0 : index
    %19 = vector.load %arg3[%c0_7, %c0_8, %c0_9] : memref<1x4x256xf32, #tpu.memory_space<vmem>>, vector<1x4x256xf32>
    %20 = vector.shape_cast %19 : vector<1x4x256xf32> to vector<4x256xf32>
    %21 = vector.shape_cast %18 : vector<4x256xf32> to vector<1x4x256xf32>
    tpu.vector_store %arg3[%c0_7, %c0_8, %c0_9], %21 {strides = array<i32>} : memref<1x4x256xf32, #tpu.memory_space<vmem>>, vector<1x4x256xf32>,
    return
  }
  func.func @transform_0(%arg0: i32) -> (i32, i32, i32) {
    %c0_i32 = arith.constant 0 : i32
    %c0_i32_0 = arith.constant 0 : i32
    %c0_i32_1 = arith.constant 0 : i32
    return %arg0, %c0_i32, %c0_i32_0 : i32, i32, i32
  }
  func.func @transform_1(%arg0: i32) -> i32 {
    %c0_i32 = arith.constant 0 : i32
    %c0_i32_0 = arith.constant 0 : i32
    return %c0_i32 : i32
  }
  func.func @transform_2(%arg0: i32) -> (i32, i32, i32) {
    %c0_i32 = arith.constant 0 : i32
    %c0_i32_0 = arith.constant 0 : i32
    %c0_i32_1 = arith.constant 0 : i32
    return %arg0, %c0_i32, %c0_i32_0 : i32, i32, i32
  }
}

</mosaic_0001>

<bundles_post_ra>
// kernel: tpu_custom_call.1
= control target key start
LH: loop header
LB: loop body
LE: loop exit
PB: predicated region body
PF: predicated region fallthrough
CT: control target
= control target key end

     0   :  { %s717_s0 = inlined_call_operand.hbm [shape: f32[2,4,256], index: 0, kind: input, shape index: {}]   ;;  %s718_s1 = inlined_call_operand.<no memory space> [shape: f32[1], index: 1, kind: input, shape index: {}]   ;;  %s719_s2 = inlined_call_operand.hbm [shape: f32[2,4,256], index: 2, kind: output, shape index: {}]  }
   0x1   :  { %7 = sst [smem:[#allocation2]] %s718_s1 }
   0x2   :  { %8 = vsyncpa [#allocation4], 0 }
   0x3   :  { %10 = vsyncpa [#allocation4 + $0x1], 0 }
   0x4   :  { %11 = vsyncpa [#allocation5], 0 }
   0x5   :  { %13 = vsyncpa [#allocation5 + $0x1], 0  ;;  %s583_s11 = smov 0   ;;  %s585_s12 = smov 0  }
   0x6   :  { %s587_s13 = smov 0   ;;  %s589_s14 = smov 0  }
   0x7 LB: > { %s604_s1 = sadd.s32 4294967295, %s563_s14   ;;  %s397_s15 = sadd.s32 4294967294, %s563_s14   ;;  %s563_s14 = sphi %s589_s14, %s729_s14   ;;  %s559_s13 = sphi %s587_s13, %s728_s13   ;;  %s555_s12 = sphi %s585_s12, %s727_s12   ;;  %s551_s11 = sphi %s583_s11, %s726_s11  }
   0x8   : > { %s608_s16 = sadd.s32 1, %s563_s14   ;;  %s26_s17 = sadd.s32 1, %s559_s13 }
   0x9   : > { %s23_s18 = ssub.s32 %s563_s14, %s608_s16  ;;  %p33_p0 = scmp.ne.s32.totalorder %s559_s13, %s555_s12 }
   0xa   : > { %p24_p1 = scmp.eq.s32.totalorder %s23_s18, 0  ;;  %p34_p2 = scmp.eq.s32.totalorder %s563_s14, 0 }
   0xb   : > { %p39_p3 = scmp.ne.s32.totalorder %s555_s12, %s551_s11  ;;  %p40_p4 = scmp.eq.s32.totalorder %s604_s1, 0 }
   0xc   : > { %s620_s19 = scalar_select %p24_p1, %s559_s13, %s26_s17  }
   0xd   : > { %p622_p5 = por %p34_p2, %p33_p0  ;;  %p626_p6 = por %p40_p4, %p39_p3 }
   0xe   : > { %p84_p7 = scmp.eq.s32.totalorder %s604_s1, 1  ;;  %p90_p8 = scmp.eq.s32.totalorder %s397_s15, 1 }
   0xf   : > { %p429_p10 = scmp.lt.s32.totalorder %s563_s14, 2  ;;  %s113_s24 = sand.u32 1, %s559_s13  }
  0x10   : > { %p633_p11 = por %p84_p7, %p33_p0  ;;  %p637_p12 = por %p90_p8, %p39_p3 }
  0x11   : > { %s415_s25 = sshll.u32 %s563_s14, 3  ;;  %s400_s26 = sshll.u32 %s113_s24, 3 }
  0x12   : > { %s122_s29 = scalar_lea.hbm %s717_s0, %s415_s25  ;;  %s117_s3 = scalar_lea.vmem [#allocation3], %s400_s26 }
  0x13   : > { %s124_s30 = sshll.u32 %s122_s29, 4  ;;  %s126_s4 = sshll.u32 %s117_s3, 4  ;;  %s125_s30 = int_to_ptr.hbm [resolvable:$true] %s124_s30  ;;  %s127_s4 = int_to_ptr.vmem [resolvable:$true] %s126_s4 }
  0x14   : > { %p648_p13 = pnand %p429_p10, %p622_p5  ;;  %p403_p0 = scmp.ge.s32.totalorder %s563_s14, 1 }
  0x15   : > { %p131_p1 = scmp.lt.s32.totalorder %s563_s14, 3  ;;  %s114_s6 = scalar_lea.sflag [#allocation4], %s113_s24 }
  0x16   : > { %s467_s7 = sshra.s32 %s125_s30, 4  ;;  %p471_p3 = pneg %p648_p13  ;;  %s468_s7 = int_to_ptr.hbm [resolvable:$true] %s467_s7 }
  0x17   : > { %s469_s8 = scalar_lea.hbm %s468_s7, 8  ;;  %s474_s15 = scalar_lea.hbm %s717_s0, 16 }
  0x18   : > { %p470_p2 = scmp.ne.s32.totalorder %s468_s7, %s469_s8  ;;  %p475_p5 = scmp.lt.s32.totalorder %s468_s7, %s717_s0 }
  0x19   : > { %p476_p8 = scmp.lt.s32.totalorder %s474_s15, %s469_s8 }
  0x1a   : > { %p472_p4 = pnand %p471_p3, %p470_p2 }
  0x1b   : > { %p477_p10 = por %p476_p8, %p475_p5 }
  0x1c   : > { %p473_p7 = pneg %p472_p4 }
  0x1e   : > { %p478_p9 = pnand %p477_p10, %p473_p7 }
  0x20   : > { %481 = shalt.err (!%p478_p9)
}
  0x21   : > { %424 = dma.hbm_to_vmem [thread:$0]  (!%p648_p13), %s125_s30, 128, %s127_s4, %s114_s6  }
  0x22   : > { %p132_p2 = pnand %p403_p0, %p131_p1 }
  0x23   : > { %s669_s20 = sand.u32 (!%p132_p2), 1, %s555_s12  }
  0x24   : > { %135 = sbr.rel (%p132_p2) target bundleno = 598 (0x256), region = 28  ;;  %s404_s24 = sshll.u32 (!%p132_p2), %s669_s20, 3 }
  0x25   : > { %s138_s25 = scalar_lea.sflag (!%p132_p2), [#allocation4], %s669_s20  ;;  %s141_s26 = scalar_lea.vmem (!%p132_p2), [#allocation3], %s404_s24 }
  0x29   : > { %542 = dma.done.wait (%p626_p6), %s138_s25, 128  }
  0x2a   : > { %544 = vsyncadd (%p626_p6), %s138_s25, 4294967168  ;;  %v163_v0 = vld [vmem:[%s141_s26] sm:$0xff]  ;;  %vm216_vm0 = vcmask 27648   ;;  %vm248_vm1 = vcmask 1043456   ;;  %vm244_vm6 = vcmask 31744   ;;  %s293_s21 = sld [smem:[#allocation2]] }
  0x2b   : > { %165 = vst [vmem:[#allocation1] ss:$2 sm:$0xff] %v163_v0  ;;  %s416_s27 = sshll.u32 %s604_s1, 3  ;;  %s162_s3 = scalar_lea.vmem [#allocation6], %s404_s24 }
  0x2c   : > { %s322_s30 = scalar_lea.hbm %s719_s2, %s416_s27  ;;  %s324_s4 = sshll.u32 %s162_s3, 4  ;;  %s325_s4 = int_to_ptr.vmem [resolvable:$true] %s324_s4 }
  0x2d   : > { %s326_s5 = sshll.u32 %s322_s30, 4  ;;  %s311_s1 = scalar_lea.sflag [#allocation5], %s669_s20  ;;  %s327_s5 = int_to_ptr.hbm [resolvable:$true] %s326_s5 }
  0x2e   : > { %s511_s6 = sshra.s32 %s327_s5, 4  ;;  %s517_s10 = scalar_lea.hbm %s719_s2, 16  ;;  %s512_s6 = int_to_ptr.hbm [resolvable:$true] %s511_s6 }
  0x2f   : > { %s513_s7 = scalar_lea.hbm %s512_s6, 8  ;;  %p518_p0 = scmp.lt.s32.totalorder %s512_s6, %s719_s2 }
  0x30   : > { %v294_v29 = vstv %s293_s21  ;;  %p514_p6 = scmp.ne.s32.totalorder %s512_s6, %s513_s7  ;;  %p519_p1 = scmp.lt.s32.totalorder %s517_s10, %s513_s7 }
  0x32   : > { %v166_v1 = vld.sshfl [vmem:[#allocation1] sm:$0xff pattern:$0x75316420]  ;;  %v167_v2 = vld.sshfl [vmem:[#allocation1 + $0x8] sm:$0xff pattern:$0x75316420]  ;;  %p515_p9 = pnand %p514_p6, %p633_p11  ;;  %p520_p3 = por %p519_p1, %p518_p0 }
  0x33   : > { %170 = vst [vmem:[#allocation1] ss:$2 sm:$0xff] %v163_v0 }
  0x34   : > { %p516_p13 = pneg %p515_p9 }
  0x36   : > { %p521_p4 = pnand %p520_p3, %p516_p13 }
  0x3a   : > { %v171_v3 = vld.sshfl [vmem:[#allocation1] sm:$0xff pattern:$0x75316420]  ;;  %v172_v4 = vld.sshfl [vmem:[#allocation1 + $0x8] sm:$0xff pattern:$0x75316420] }
  0x3b   : > { %190 = vmatpush.xpose.msra.mxu0 %v171_v3  ;;  %210 = vmatpush.xpose.msra.mxu1 %v172_v4  ;;  %241 = vst [vmem:[#allocation1] ss:$2 sm:$0xff] %v163_v0 }
  0x3e   : > { %191 = vmatmul.f32.vlgmr.msra.gmra.mxu0 %v166_v1  ;;  %211 = vmatmul.f32.vlgmr.msra.gmra.mxu1 %v167_v2 }
  0x42   : > { %v242_v15 = vld.sshfl [vmem:[#allocation1] sm:$0xff pattern:$0x75316420]  ;;  %v243_v16 = vld.sshfl [vmem:[#allocation1 + $0x8] sm:$0xff pattern:$0x75316420] }
  0x43   : > { %406 = vmatpush.msk.msra.mxu2 %vm248_vm1, %v242_v15  ;;  %408 = vmatpush.msk.msra.mxu3 %vm248_vm1, %v243_v16  ;;  %297 = vst [vmem:[#allocation1] ss:$2 sm:$0xff] %v163_v0 }
  0x4a   : > { %v299_v32 = vld.sshfl [vmem:[#allocation1 + $0x8] sm:$0xff pattern:$0x75316420]  ;;  %v298_v35 = vld.sshfl [vmem:[#allocation1] sm:$0xff pattern:$0x75316420] }
  0xbb   : > { %v192_v5 = vpop.f32.mrf.mxu0  ;;  %v212_v6 = vpop.f32.mrf.mxu1 }
  0xbc   : > { %v213_v7 = vadd.f32 %v212_v6, %v192_v5 }
  0xbe   : > { %v215_v8 = vsub.f32 0.0, %v213_v7 }
  0xc0   : > { %v217_v9 = vsel %vm216_vm0, %v215_v8, -inf }
  0xc1   : > { %218 = vmax.xlane.f32.xlu0 %v217_v9 }
 0x134   : > { %v219_v10 = vpop.xlane.xlu0 %218 }
 0x135   : > { %v220_v11 = vsub.f32 %v215_v8, %v219_v10 }
 0x137   : > { %v221_v12 = vmul.f32 1.442695, %v220_v11 }
 0x139   : > { %463 = vpow2.f32 %v221_v12 }
 0x13f   : > { %v464_v13 = vpop.eup %463 }
 0x140   : > { %v223_v14 = vsel %vm216_vm0, %v464_v13, 0.0 }
 0x141   : > { %224 = vadd.xlane.f32.xlu0 %v223_v14 }
 0x1b4   : > { %v225_v17 = vpop.xlane.xlu0 %224 }
 0x1b5   : > { %465 = vrcp.f32 %v225_v17  ;;  %v237_v21 = vand.u32 2147483648, %v225_v17  ;;  %v235_v23 = vand.u32 2147483647, %v225_v17  ;;  %vm231_vm3 = vweird.f32 %v225_v17 }
 0x1b7   : > { %v238_v25 = vor.u32 1.1754944e-38, %v237_v21  ;;  %vm236_vm5 = vcmp.eq.f32.partialorder %v235_v23, 8.507059e+37 }
 0x1bb   : > { %v466_v18 = vpop.eup %465 }
 0x1bc   : > { %v227_v19 = vmul.f32 %v466_v18, %v225_v17  ;;  %vm232_vm2 = vweird.f32 %v466_v18 }
 0x1bd   : > { %vm233_vm4 = vmor %vm231_vm3, %vm232_vm2 }
 0x1be   : > { %v228_v20 = vsub.f32 1.0, %v227_v19 }
 0x1c0   : > { %v229_v22 = vmul.f32 %v466_v18, %v228_v20 }
 0x1c2   : > { %v230_v24 = vadd.f32 %v466_v18, %v229_v22 }
 0x1c4   : > { %v234_v26 = vsel %vm233_vm4, %v466_v18, %v230_v24 }
 0x1c5   : > { %v239_v27 = vsel %vm236_vm5, %v238_v25, %v234_v26 }
 0x1c6   : > { %v240_v28 = vmul.f32 %v464_v13, %v239_v27 }
 0x1c8   : > { %407 = vmatmul.msk.f32.vlgmr.msra.gmra.mxu2 %vm244_vm6, %v240_v28  ;;  %409 = vmatmul.msk.f32.vlgmr.msra.gmra.mxu3 %vm244_vm6, %v240_v28 }
 0x24b   : > { %v270_v30 = vpop.f32.mrf.mxu2  ;;  %v290_v31 = vpop.f32.mrf.mxu3 }
 0x24c   : > { %v295_v33 = vmul.f32 %v294_v29, %v270_v30  ;;  %v296_v34 = vmul.f32 %v294_v29, %v290_v31 }
 0x24e   : > { %v303_v36 = vadd.f32 %v299_v32, %v296_v34  ;;  %v302_v37 = vadd.f32 %v298_v35, %v295_v33 }
 0x250   : > { %v306_v38 = vrot.slane %v303_v36, 4 }
 0x252   : > { %v307_v39 = vsel %vm248_vm1, %v302_v37, %v306_v38 }
 0x253   : > { %309 = vst [vmem:[%s162_s3] sm:$0xff] %v307_v39 }
 0x254   : > { %524 = shalt.err (!%p521_p4)
}
 0x255   : > { %419 = dma.vmem_to_hbm [thread:$0]  (%p633_p11), %s325_s4, 128, %s327_s5, %s311_s1  }
 0x256 PF: > { %s338_s18 = sand.u32 1, %s551_s11   ;;  %p725_p7 = scmp.ge.s32.totalorder %s563_s14, 2 }
 0x257   : > { %s339_s20 = scalar_lea.sflag [#allocation5], %s338_s18 }
 0x258   : > { %p426_p5 = pnand %p725_p7, %p637_p12 }
 0x25a   : > { %p427_p8 = pneg %p426_p5 }
 0x25c   : > { %546 = dma.done.wait (%p427_p8), %s339_s20, 128  }
 0x25d   : > { %548 = vsyncadd (%p427_p8), %s339_s20, 4294967168  ;;  %p16_p10 = scmp.ge.s32.totalorder %s608_s16, 4   ;;  %s726_s11 = smov %s555_s12 }
 0x25e   : > { %s727_s12 = smov %s559_s13  ;;  %s728_s13 = smov %s620_s19 }
 0x25f   : > { %s729_s14 = smov %s608_s16  ;;  %18 = sbr.rel (!%p16_p10) target bundleno = 7 (0x7), region = 73 }
 0x264   :  { %345 = vsyncpa [#allocation4], 1 }
 0x265   :  { %347 = vsyncpa [#allocation4 + $0x1], 1 }
 0x266   :  { %348 = vsyncpa [#allocation5], 1 }
 0x267   :  { %350 = vsyncpa [#allocation5 + $0x1], 1 }

</bundles_post_ra>
